<compile_context>
chip_gen: v7x
topology: tpu7x:2x2x1
jax: 0.10.0
libtpu: 0.0.40
codegen_flags: <defaults>
</compile_context>

<pallas_src>
import functools
import math

import jax
import jax.numpy as jnp
from jax import lax
from jax.experimental import pallas as pl
from jax.experimental.pallas import tpu as pltpu

_COMPUTE_DTYPE = jnp.bfloat16        # MXU-native feed; accumulation stays f32


# ----------------------------------------------------------------------------
# sizing helpers
# ----------------------------------------------------------------------------
def _round_up(x, m):
    return -(-x // m) * m


def _largest_divisor(n, cap, unit):
    """Largest d <= cap with d % unit == 0 and n % d == 0, else None."""
    best, d, lim = None, unit, min(cap, n)
    while d <= lim:
        if n % d == 0:
            best = d
        d += unit
    return best


def _lane_tile(dim, cap):
    """128-aligned tile for a lane (last) dim, or the full dim (always legal)."""
    return _largest_divisor(dim, cap, 128) or dim


def _row_tile(dim, cap):
    """8-aligned tile for a sublane dim, or the full dim (always legal)."""
    return _largest_divisor(dim, cap, 8) or dim


def _vmem_limit_bytes():
    """Generation-gated scoped-VMEM budget: half of physical, clamped to [32, 64] MiB."""
    cap = 128 * 1024 * 1024
    try:
        cap = int(getattr(pltpu.get_tpu_info(), "vmem_capacity_bytes", cap))
    except Exception:            # interpret mode / unusual backends: conservative default
        pass
    return max(32 * 1024 * 1024, min(cap // 2, 64 * 1024 * 1024))


def _choose_head_group(nb_heads, head_dim, hidden):
    """Heads per grid step G: lane width G*D is 128-aligned (bounded VMEM) or the full H."""
    if hidden <= 128:
        return nb_heads, 1
    for g in range(1, nb_heads + 1):
        if nb_heads % g == 0 and (g * head_dim) % 128 == 0:
            return g, nb_heads // g
    # H itself is not 128-aligned: full-H blocks are always legal; the VMEM-budget-aware
    # tile chooser below shrinks Tq/Tkv to keep scratch bounded in this fallback.
    return nb_heads, 1


def _choose_attn_tiles(m, span, heads, head_dim, elt_bytes, budget, want_split):
    """Returns (tq, tkv, span_p, n_q, n_kv, step); span is padded up to span_p = n_kv*tkv - tq."""
    dg = heads * head_dim
    divs = [t for t in range(8, min(m, 512) + 1, 8) if m % t == 0]
    if not divs:
        # No 8-aligned divisor of M: one tile over the whole sequence / window.
        return m, m + span, span, 1, 1, 0

    # keep the masked triangles small: Tq not much larger than the span.
    cap_q = max(64, min(512, _round_up(span, 8)))
    cands = [t for t in divs if t <= cap_q] or divs
    if want_split:                                   # keep both v7x TensorCores fed
        cands = [t for t in cands if t < m] or cands
    cands = sorted(cands, reverse=True)

    def plan(tq):
        tkv = _largest_divisor(tq, 512, 128) or _largest_divisor(tq, 512, 8)
        span_p = _round_up(span, tkv)
        n_kv = (tq + span_p) // tkv
        width = tq + span_p
        vmem = (2 * tq * dg * elt_bytes              # q blocks (double buffered)
                + 4 * tkv * dg * elt_bytes           # k + v blocks
                + 2 * tq * dg * elt_bytes            # out blocks
                + head_dim * span_p * elt_bytes      # key_pe
                + tq * dg * elt_bytes                # pre-scaled q scratch
                + heads * tq * width * 4             # skewed positional logits (f32)
                + heads * tq * (head_dim + 2) * 4)   # m / l / acc accumulators
        return tq, tkv, span_p, n_kv, vmem

    plans = [plan(t) for t in cands]
    fitting = [p for p in plans if p[4] <= budget]
    tq, tkv, span_p, n_kv, _ = fitting[0] if fitting else min(plans, key=lambda p: p[4])
    return tq, tkv, span_p, m // tq, n_kv, tq // tkv


# ----------------------------------------------------------------------------
# band -> full-window skew:  full[r, r + j] = band[r, j]   (other columns are masked later)
# One strided XLU roll: row r rotated right by r lanes.
# ----------------------------------------------------------------------------
def _skew_rows(band, width):
    tq, s = band.shape
    if width > s:
        band = jnp.concatenate([band, jnp.zeros((tq, width - s), band.dtype)], axis=1)
    return pltpu.roll(band, shift=0, axis=1, stride=1, stride_axis=0)


# ----------------------------------------------------------------------------
# tiled linear:  y = x @ W.T   (nn.Linear convention), bf16 MXU feed, f32 accumulation
# ----------------------------------------------------------------------------
def _linear_kernel(x_ref, w_ref, o_ref, acc_ref, *, n_k):
    @pl.when(pl.program_id(2) == 0)
    def _():
        acc_ref[...] = jnp.zeros_like(acc_ref)

    # Contract dim 1 of both operands (x @ W.T) so no wrapper-side weight transpose is
    # materialized.  TODO(synk): if the MLIR dump shows a per-tile relayout of w_ref,
    # pre-transpose W once at the JAX level instead.
    acc_ref[...] += lax.dot_general(
        x_ref[...], w_ref[...],
        dimension_numbers=(((1,), (1,)), ((), ())),
        preferred_element_type=jnp.float32)

    @pl.when(pl.program_id(2) == n_k - 1)
    def _():
        o_ref[...] = acc_ref[...].astype(o_ref.dtype)


def linear(x2d, w, out_dtype=None, compute_dtype=_COMPUTE_DTYPE):
    """x2d: (N, H_in), w: (H_out, H_in) -> (N, H_out)."""
    n, h_in = x2d.shape
    h_out = w.shape[0]
    out_dtype = out_dtype if out_dtype is not None else x2d.dtype
    x2d = x2d.astype(compute_dtype)       # bf16 MXU feed; halves HBM traffic into the kernel
    w = w.astype(compute_dtype)

    tm = _row_tile(n, 1024)
    tn = _lane_tile(h_out, 512)           # typically tn == h_out -> activations streamed once
    tk = _lane_tile(h_in, 512)
    n_k = h_in // tk

    return pl.pallas_call(
        functools.partial(_linear_kernel, n_k=n_k),
        out_shape=jax.ShapeDtypeStruct((n, h_out), out_dtype),
        grid_spec=pltpu.PrefetchScalarGridSpec(
            num_scalar_prefetch=0,
            # output-column axis outermost: the (small) weight is the re-streamed operand.
            grid=(h_out // tn, n // tm, n_k),
            in_specs=[
                pl.BlockSpec((tm, tk), lambda j, i, k: (i, k)),
                pl.BlockSpec((tn, tk), lambda j, i, k: (j, k)),
            ],
            out_specs=pl.BlockSpec((tm, tn), lambda j, i, k: (i, j)),
            scratch_shapes=[pltpu.VMEM((tm, tn), jnp.float32)],
        ),
        compiler_params=pltpu.CompilerParams(
            dimension_semantics=("parallel", "parallel", "arbitrary"),
            vmem_limit_bytes=_vmem_limit_bytes()),
    )(x2d, w)


# ----------------------------------------------------------------------------
# banded (sequential) multi-head attention
# grid = (batch, head_group, q_tile, kv_chunk); kv_chunk is the innermost reduction.
# ----------------------------------------------------------------------------
def _attn_kernel(q_ref, k_ref, v_ref, pe_ref, o_ref,
                 qs_scr, m_scr, l_scr, acc_scr, pos_scr, *,
                 heads, head_dim, span, tq, tkv, n_kv):
    kv = pl.program_id(3)
    D = head_dim
    scale = 1.0 / math.sqrt(D)
    width = n_kv * tkv                     # = tq + padded span
    MASK = -1e38                           # strictly below MINIT so exp underflows to exactly 0
    MINIT = -1e30

    # ---- per-query-tile init: pre-scaled q, skewed positional logits, softmax state ----
    @pl.when(kv == 0)
    def _init():
        qs = q_ref[0] * scale              # fold 1/sqrt(D) once per q tile (bf16)
        qs_scr[...] = qs
        pe = pe_ref[...]                   # (D, span_p) bf16
        for h in range(heads):
            qs_h = qs[:, h * D:(h + 1) * D]
            band = lax.dot_general(        # (tq, span_p) = (q*scale) @ key_pe   (MXU, bf16->f32)
                qs_h, pe, (((1,), (0,)), ((), ())),
                preferred_element_type=jnp.float32)
            full = _skew_rows(band, width)            # (tq, width): full[r, r + j] = band[r, j]
            for c in range(n_kv):
                pos_scr[h, c] = full[:, c * tkv:(c + 1) * tkv]
            m_scr[h] = jnp.full((tq, 1), MINIT, jnp.float32)
            l_scr[h] = jnp.zeros((tq, 1), jnp.float32)
            acc_scr[h] = jnp.zeros((tq, D), jnp.float32)

    # ---- one key/value chunk of the banded window ----
    qs = qs_scr[...]                       # (tq,  G*D) bf16, pre-scaled
    k = k_ref[0]                           # (tkv, G*D) bf16
    v = v_ref[0]

    r_idx = lax.broadcasted_iota(jnp.int32, (tq, tkv), 0)
    w_idx = lax.broadcasted_iota(jnp.int32, (tq, tkv), 1)
    rel = w_idx - r_idx + kv * tkv         # key offset j relative to the query row
    band_ok = jnp.logical_and(rel >= 0, rel < span)

    for h in range(heads):
        qs_h = qs[:, h * D:(h + 1) * D]
        k_h = k[:, h * D:(h + 1) * D]
        v_h = v[:, h * D:(h + 1) * D]

        s = lax.dot_general(               # (tq, tkv) content scores on the MXU (bf16 -> f32)
            qs_h, k_h, (((1,), (1,)), ((), ())),
            preferred_element_type=jnp.float32)
        s = s + pos_scr[h, kv]             # already scaled (q was pre-scaled)
        s = jnp.where(band_ok, s, MASK)

        m_prev = m_scr[h]                  # (tq, 1)
        m_new = jnp.maximum(m_prev, jnp.max(s, axis=-1, keepdims=True))
        alpha = jnp.exp(m_prev - m_new)
        p = jnp.exp(s - m_new)             # masked entries underflow to exactly 0

        l_scr[h] = alpha * l_scr[h] + jnp.sum(p, axis=-1, keepdims=True)
        acc_scr[h] = alpha * acc_scr[h] + lax.dot_general(
            p.astype(v_h.dtype), v_h, (((1,), (0,)), ((), ())),
            preferred_element_type=jnp.float32)
        m_scr[h] = m_new

    # ---- finalize: normalize and emit one lane-dense output block ----
    @pl.when(kv == n_kv - 1)
    def _done():
        outs = []
        for h in range(heads):
            l_h = l_scr[h]
            inv = pl.reciprocal(l_h, approx=True)
            inv = inv * (2.0 - l_h * inv)  # one Newton step -> full precision
            outs.append(acc_scr[h] * inv)
        o = outs[0] if heads == 1 else jnp.concatenate(outs, axis=-1)
        o_ref[0] = o.astype(o_ref.dtype)


def seq_attention(q, k, v, key_pe2d, *, nb_heads):
    """q: (B, M, H), k/v: (B, M + span, H), key_pe2d: (D, span) -> (B, M, H)."""
    B, M, H = q.shape
    L = k.shape[1]
    D = H // nb_heads
    span = key_pe2d.shape[-1]
    assert L == M + span

    G, n_groups = _choose_head_group(nb_heads, D, H)
    dg = G * D
    vmem_limit = _vmem_limit_bytes()
    elt = jnp.dtype(q.dtype).itemsize
    tq, tkv, span_p, n_q, n_kv, step = _choose_attn_tiles(
        M, span, G, D, elt, int(0.75 * vmem_limit),
        want_split=(B * n_groups == 1))

    if span_p > span:                      # pad key window so kv chunks stay 8/128-friendly;
        pad = span_p - span                # the rel < span mask neutralizes the padded tail.
        k = jnp.pad(k, ((0, 0), (0, pad), (0, 0)))
        v = jnp.pad(v, ((0, 0), (0, pad), (0, 0)))
        key_pe2d = jnp.pad(key_pe2d, ((0, 0), (0, pad)))

    kernel = functools.partial(
        _attn_kernel, heads=G, head_dim=D, span=span, tq=tq, tkv=tkv, n_kv=n_kv)

    return pl.pallas_call(
        kernel,
        out_shape=jax.ShapeDtypeStruct((B, M, H), q.dtype),
        grid_spec=pltpu.PrefetchScalarGridSpec(
            num_scalar_prefetch=0,
            grid=(B, n_groups, n_q, n_kv),
            in_specs=[
                pl.BlockSpec((1, tq, dg), lambda b, g, i, c: (b, i, g)),
                pl.BlockSpec((1, tkv, dg), lambda b, g, i, c: (b, i * step + c, g)),
                pl.BlockSpec((1, tkv, dg), lambda b, g, i, c: (b, i * step + c, g)),
                pl.BlockSpec((D, span_p), lambda b, g, i, c: (0, 0)),
            ],
            out_specs=pl.BlockSpec((1, tq, dg), lambda b, g, i, c: (b, i, g)),
            scratch_shapes=[
                pltpu.VMEM((tq, dg), q.dtype),                  # pre-scaled q tile (bf16)
                pltpu.VMEM((G, tq, 1), jnp.float32),            # running max
                pltpu.VMEM((G, tq, 1), jnp.float32),            # running denominator
                pltpu.VMEM((G, tq, D), jnp.float32),            # per-head output accumulators
                pltpu.VMEM((G, n_kv, tq, tkv), jnp.float32),    # skewed positional logits
            ],
        ),
        compiler_params=pltpu.CompilerParams(
            dimension_semantics=("parallel", "parallel", "parallel", "arbitrary"),
            vmem_limit_bytes=vmem_limit),
    )(q, k, v, key_pe2d)


# ----------------------------------------------------------------------------
# full module forward (reshapes are free views; no head transposes in HBM)
# ----------------------------------------------------------------------------
def multi_head_seq_sym_attention(query, key, value, key_pe, params, nb_heads,
                                 compute_dtype=_COMPUTE_DTYPE):
    B, M, H = query.shape
    L = key.shape[1]
    span = key_pe.shape[-1]
    assert L == M + span and H % nb_heads == 0

    Wk, Wv, Wo = params["proj_key"], params["proj_val"], params["proj_out"]

    # proj_key is shared by query and key ("Sym"): fuse both into one matmul so Wk streams
    # from HBM once and the projection grid stays long (bandwidth-bound on v5e).
    qk_rows = jnp.concatenate(
        [query.reshape(B * M, H).astype(compute_dtype),
         key.reshape(B * L, H).astype(compute_dtype)], axis=0)
    qk = linear(qk_rows, Wk, out_dtype=compute_dtype)
    q = qk[:B * M].reshape(B, M, H)
    k = qk[B * M:].reshape(B, L, H)
    v = linear(value.reshape(B * L, H).astype(compute_dtype), Wv,
               out_dtype=compute_dtype).reshape(B, L, H)

    out = seq_attention(q, k, v, key_pe[0].astype(compute_dtype), nb_heads=nb_heads)
    out = linear(out.reshape(B * M, H), Wo, out_dtype=query.dtype).reshape(B, M, H)
    return out


# ----------------------------------------------------------------------------
# pure-JAX reference (literal unskew/skew semantics, f32) for validation
# ----------------------------------------------------------------------------
def _ref_forward(query, key, value, key_pe, params, nb_heads):
    B, M, H = query.shape
    K = nb_heads
    D = H // K
    L = key.shape[1]
    span = L - M
    Wk, Wv, Wo = params["proj_key"], params["proj_val"], params["proj_out"]

    q = query @ Wk.T
    k = key @ Wk.T
    v = value @ Wv.T

    def hr(x):
        T = x.shape[1]
        return x.reshape(B, T, K, D).transpose(0, 2, 1, 3).reshape(B * K, T, D)

    q, k, v = hr(q), hr(k), hr(v)
    scores = jnp.einsum("bmd,bld->bml", q, k)                        # (BK, M, L)
    idx = jnp.arange(M)[:, None] + jnp.arange(span)[None, :]         # (M, span)
    cont = jnp.take_along_axis(
        scores, jnp.broadcast_to(idx[None], (B * K, M, span)), axis=2)    # == _unskew
    pos = jnp.einsum("bmd,ds->bms", q, key_pe[0])
    attn = jax.nn.softmax((cont + pos) / math.sqrt(D), axis=-1)
    v_g = v[:, idx, :]                                               # (BK, M, span, D)
    out = jnp.einsum("bms,bmsd->bmd", attn, v_g)                     # == _skew @ v
    out = out.reshape(B, K, M, D).transpose(0, 2, 1, 3).reshape(B, M, H)
    return out @ Wo.T


if __name__ == "__main__":
    B, M, H, K = 2, 16, 32, 4
    D = H // K
    span = 8
    L = M + span

    root = jax.random.PRNGKey(0)
    ks = jax.random.split(root, 7)
    query = jax.random.normal(ks[0], (B, M, H), jnp.float32)
    key_in = jax.random.normal(ks[1], (B, L, H), jnp.float32)
    value_in = jax.random.normal(ks[2], (B, L, H), jnp.float32)
    key_pe = jax.random.normal(ks[3], (1, D, span), jnp.float32)

    init = 1.0 / math.sqrt(H)
    params = {
        "proj_key": jax.random.normal(ks[4], (H, H), jnp.float32) * init,
        "proj_val": jax.random.normal(ks[5], (H, H), jnp.float32) * init,
        "proj_out": jax.random.normal(ks[6], (H, H), jnp.float32) * init,
    }

    out = multi_head_seq_sym_attention(query, key_in, value_in, key_pe, params, K)
    out = jax.block_until_ready(out)

    ref = _ref_forward(query, key_in, value_in, key_pe, params, K)
    assert out.shape == (B, M, H)
    # bf16 MXU feeds -> compare against the f32 reference at bf16-level tolerance.
    assert jnp.allclose(out, ref, atol=1e-1, rtol=1e-1), "mismatch vs reference"
    print("KERNEL_OK")
</pallas_src>

<mosaic_0001>
module attributes {stable_mosaic.version = 11 : i64} {
  func.func @_linear_kernel(%arg0: i32, %arg1: i32, %arg2: i32, %arg3: memref<80x32xbf16, #tpu.memory_space<vmem>>, %arg4: memref<32x32xbf16, #tpu.memory_space<vmem>>, %arg5: memref<80x32xbf16, #tpu.memory_space<vmem>>, %arg6: memref<80x32xf32, #tpu.memory_space<vmem>>) attributes {dimension_semantics = [#tpu.dimension_semantics<parallel>, #tpu.dimension_semantics<parallel>, #tpu.dimension_semantics<arbitrary>], iteration_bounds = array<i64: 1, 1, 1>, scalar_prefetch = 0 : i64, scratch_operands = 1 : i64, tpu.core_type = #tpu.core_type<tc>, window_params = [{transform_indices = @transform_0, window_bounds = array<i64: 80, 32>}, {transform_indices = @transform_1, window_bounds = array<i64: 32, 32>}, {transform_indices = @transform_2, window_bounds = array<i64: 80, 32>}]} {
    %c0_i32 = arith.constant 0 : i32
    %0 = arith.cmpi eq, %arg2, %c0_i32 : i32
    %1 = arith.extui %0 : i1 to i32
    %c0_i32_0 = arith.constant 0 : i32
    %2 = arith.cmpi ne, %1, %c0_i32_0 : i32
    scf.if %2 {
      %cst_10 = arith.constant 0.000000e+00 : f32
      %12 = vector.broadcast %cst_10 : f32 to vector<80x32xf32>
      %c0_11 = arith.constant 0 : index
      %c0_12 = arith.constant 0 : index
      %13 = vector.load %arg6[%c0_11, %c0_12] : memref<80x32xf32, #tpu.memory_space<vmem>>, vector<80x32xf32>
      tpu.vector_store %arg6[%c0_11, %c0_12], %12 {strides = array<i32>} : memref<80x32xf32, #tpu.memory_space<vmem>>, vector<80x32xf32>,
    } else {
    }
    %c0 = arith.constant 0 : index
    %c0_1 = arith.constant 0 : index
    %3 = vector.load %arg6[%c0, %c0_1] : memref<80x32xf32, #tpu.memory_space<vmem>>, vector<80x32xf32>
    %c0_2 = arith.constant 0 : index
    %c0_3 = arith.constant 0 : index
    %4 = vector.load %arg3[%c0_2, %c0_3] : memref<80x32xbf16, #tpu.memory_space<vmem>>, vector<80x32xbf16>
    %c0_4 = arith.constant 0 : index
    %c0_5 = arith.constant 0 : index
    %5 = vector.load %arg4[%c0_4, %c0_5] : memref<32x32xbf16, #tpu.memory_space<vmem>>, vector<32x32xbf16>
    %cst = arith.constant dense<0.000000e+00> : vector<80x32xf32>
    %6 = tpu.matmul %4, %5, %cst {dimension_numbers = #tpu.dot_dimension_numbers<[1], [1], [0], [0], [0, 0, 1, 0], [], []>} : vector<80x32xbf16>, vector<32x32xbf16>, vector<80x32xf32> -> vector<80x32xf32>
    %7 = arith.addf %3, %6 : vector<80x32xf32>
    %c0_6 = arith.constant 0 : index
    %c0_7 = arith.constant 0 : index
    %8 = vector.load %arg6[%c0_6, %c0_7] : memref<80x32xf32, #tpu.memory_space<vmem>>, vector<80x32xf32>
    tpu.vector_store %arg6[%c0_6, %c0_7], %7 {strides = array<i32>} : memref<80x32xf32, #tpu.memory_space<vmem>>, vector<80x32xf32>,
    %c0_i32_8 = arith.constant 0 : i32
    %9 = arith.cmpi eq, %arg2, %c0_i32_8 : i32
    %10 = arith.extui %9 : i1 to i32
    %c0_i32_9 = arith.constant 0 : i32
    %11 = arith.cmpi ne, %10, %c0_i32_9 : i32
    scf.if %11 {
      %c0_10 = arith.constant 0 : index
      %c0_11 = arith.constant 0 : index
      %12 = vector.load %arg6[%c0_10, %c0_11] : memref<80x32xf32, #tpu.memory_space<vmem>>, vector<80x32xf32>
      %13 = arith.truncf %12 : vector<80x32xf32> to vector<80x32xbf16>
      %c0_12 = arith.constant 0 : index
      %c0_13 = arith.constant 0 : index
      %14 = vector.load %arg5[%c0_12, %c0_13] : memref<80x32xbf16, #tpu.memory_space<vmem>>, vector<80x32xbf16>
      tpu.vector_store %arg5[%c0_12, %c0_13], %13 {strides = array<i32>} : memref<80x32xbf16, #tpu.memory_space<vmem>>, vector<80x32xbf16>,
    } else {
    }
    return
  }
  func.func @transform_0(%arg0: i32, %arg1: i32, %arg2: i32) -> (i32, i32) {
    %c0_i32 = arith.constant 0 : i32
    return %arg1, %arg2 : i32, i32
  }
  func.func @transform_1(%arg0: i32, %arg1: i32, %arg2: i32) -> (i32, i32) {
    %c0_i32 = arith.constant 0 : i32
    return %arg0, %arg2 : i32, i32
  }
  func.func @transform_2(%arg0: i32, %arg1: i32, %arg2: i32) -> (i32, i32) {
    %c0_i32 = arith.constant 0 : i32
    return %arg1, %arg0 : i32, i32
  }
}

</mosaic_0001>

<bundles_post_ra>
// kernel: tpu_custom_call.1
= control target key start
LH: loop header
LB: loop body
LE: loop exit
PB: predicated region body
PF: predicated region fallthrough
CT: control target
= control target key end

     0   :  { %7 = vsyncpa [#allocation4], 0  ;;  %s574_s0 = inlined_call_operand.hbm [shape: bf16[80,32], index: 0, kind: input, shape index: {}]   ;;  %s575_s1 = inlined_call_operand.hbm [shape: bf16[32,32], index: 1, kind: input, shape index: {}]   ;;  %s576_s2 = inlined_call_operand.hbm [shape: bf16[80,32], index: 2, kind: output, shape index: {}]  }
   0x1   :  { %8 = vsyncpa [#allocation7], 0 }
   0x2   :  { %9 = vsyncpa [#allocation5], 0  ;;  %s465_s9 = smov [#allocation3]   ;;  %s393_s13 = scalar_lea.hbm %s574_s0, 640 }
   0x3   :  { %s15_s10 = sshll.u32 %s465_s9, 4  ;;  %p394_p0 = scmp.ne.s32.totalorder %s574_s0, %s393_s13  ;;  %s16_s10 = int_to_ptr.vmem [resolvable:$true] %s15_s10 }
   0x4   :  { %p397_p1 = scmp.lt.u32.totalorder %s393_s13, %s574_s0 }
   0x6   :  { %p399_p2 = pnand %p397_p1, %p394_p0 }
   0x8   :  { %402 = shalt.err (!%p399_p2)
}
   0x9   :  { %s403_s18 = scalar_lea.vmem %s16_s10, 640  ;;  %p408_p4 = scmp.lt.s32.totalorder %s16_s10, %s16_s10 }
   0xa   :  { %p404_p3 = scmp.ne.s32.totalorder %s16_s10, %s403_s18  ;;  %p409_p5 = scmp.lt.s32.totalorder %s403_s18, %s403_s18 }
   0xc   :  { %p410_p6 = por %p409_p5, %p408_p4 }
   0xe   :  { %p411_p7 = pnand %p410_p6, %p404_p3 }
  0x10   :  { %414 = shalt.err (!%p411_p7)
}
  0x11   :  { %s466_s19 = smov 64   ;;  %s467_s20 = smov 4  }
  0x12   :  { %21 = dma.hbm_to_vmem [thread:$0]  %s574_s0, 640, %s16_s10, [#allocation4], %s466_s19, %s466_s19, %s467_s20  }
  0x13   :  { %s468_s23 = smov [#allocation6]   ;;  %s415_s27 = scalar_lea.hbm %s575_s1, 256 }
  0x14   :  { %s27_s24 = sshll.u32 %s468_s23, 4  ;;  %p416_p8 = scmp.ne.s32.totalorder %s575_s1, %s415_s27  ;;  %s28_s24 = int_to_ptr.vmem [resolvable:$true] %s27_s24 }
  0x15   :  { %p419_p9 = scmp.lt.u32.totalorder %s415_s27, %s575_s1 }
  0x17   :  { %p421_p10 = pnand %p419_p9, %p416_p8 }
  0x19   :  { %424 = shalt.err (!%p421_p10)
}
  0x1a   :  { %s425_s4 = scalar_lea.vmem %s28_s24, 256  ;;  %p430_p12 = scmp.lt.s32.totalorder %s28_s24, %s28_s24 }
  0x1b   :  { %p426_p11 = scmp.ne.s32.totalorder %s28_s24, %s425_s4  ;;  %p431_p13 = scmp.lt.s32.totalorder %s425_s4, %s425_s4 }
  0x1d   :  { %p432_p0 = por %p431_p13, %p430_p12 }
  0x1f   :  { %p433_p1 = pnand %p432_p0, %p426_p11 }
  0x21   :  { %436 = shalt.err (!%p433_p1)
}
  0x22   :  { %33 = dma.hbm_to_vmem [thread:$0]  %s575_s1, 256, %s28_s24, [#allocation7], %s466_s19, %s466_s19, %s467_s20  }
  0x23   :  { %459 = dma.done.wait [#allocation4], 640  }
  0x24   :  { %460 = vsyncadd [#allocation4], 4294966656 }
  0x25   :  { %461 = dma.done.wait [#allocation7], 256  }
  0x26   :  { %462 = vsyncadd [#allocation7], 4294967040  ;;  %vm45_vm0 = vcmask 261120   ;;  %v469_v0 = vmov 0.0   ;;  %vm470_vm1 = vmmov 0   ;;  %v386_v1 = vld [vmem:[#allocation6] sm:$0xff]  }
  0x27   :  { %351 = vmatprep.subr.bf16.mxu0 %v469_v0  ;;  %46 = vst.msk [vmem:[#allocation2] sm:$0xff] %vm45_vm0, %v469_v0  ;;  %47 = vst.msk [vmem:[#allocation2 + $0x8] sm:$0xff] %vm45_vm0, %v469_v0  ;;  %375 = vmatprep.subr.bf16.mxu1 %v469_v0  ;;  %v132_v2 = vsel %vm45_vm0, %v386_v1, 0  ;;  %v387_v3 = vld [vmem:[#allocation6 + $0x8] sm:$0xff]   ;;  %v388_v5 = vld [vmem:[#allocation3] sm:$0xff]   ;;  %vm283_vm2 = vcmask 257024  }
  0x28   :  { %48 = vst.msk [vmem:[#allocation2 + $0x10] sm:$0xff] %vm45_vm0, %v469_v0  ;;  %49 = vst.msk [vmem:[#allocation2 + $0x18] sm:$0xff] %vm45_vm0, %v469_v0  ;;  %355 = vmatprep.mubr.msk.bf16.mxu0 %vm470_vm1, %v469_v0  ;;  %367 = vmatprep.mubr.msk.bf16.mxu1 %vm470_vm1, %v469_v0  ;;  %v135_v4 = vsel %vm45_vm0, %v387_v3, 0  ;;  %v389_v6 = vld [vmem:[#allocation3 + $0x18] sm:$0xff]   ;;  %v390_v7 = vld [vmem:[#allocation3 + $0x8] sm:$0xff]   ;;  %s471_s1 = smov [#allocation8]  }
  0x29   :  { %50 = vst.msk [vmem:[#allocation2 + $0x20] sm:$0xff] %vm45_vm0, %v469_v0  ;;  %51 = vst.msk [vmem:[#allocation2 + $0x28] sm:$0xff] %vm45_vm0, %v469_v0  ;;  %352 = vmatpush3.bf16.xpose.msra.mxu0 %v132_v2  ;;  %377 = vmatpush3.bf16.xpose.msra.mxu1 %v132_v2  ;;  %v391_v8 = vld [vmem:[#allocation3 + $0x20] sm:$0xff]   ;;  %v392_v9 = vld [vmem:[#allocation3 + $0x10] sm:$0xff]   ;;  %s299_s6 = sshll.u32 %s471_s1, 4  ;;  %s300_s6 = int_to_ptr.vmem [resolvable:$true] %s299_s6 }
  0x2a   :  { %52 = vst.msk [vmem:[#allocation2 + $0x30] sm:$0xff] %vm45_vm0, %v469_v0  ;;  %53 = vst.msk [vmem:[#allocation2 + $0x38] sm:$0xff] %vm45_vm0, %v469_v0  ;;  %353 = vmatprep.subr.bf16.mxu0 %v469_v0  ;;  %376 = vmatprep.subr.bf16.mxu1 %v469_v0  ;;  %s437_s7 = scalar_lea.vmem %s300_s6, 640  ;;  %p442_p3 = scmp.lt.s32.totalorder %s300_s6, %s300_s6 }
  0x2b   :  { %54 = vst.msk [vmem:[#allocation2 + $0x40] sm:$0xff] %vm45_vm0, %v469_v0  ;;  %55 = vst.msk [vmem:[#allocation2 + $0x48] sm:$0xff] %vm45_vm0, %v469_v0  ;;  %p438_p2 = scmp.ne.s32.totalorder %s300_s6, %s437_s7  ;;  %p443_p4 = scmp.lt.s32.totalorder %s437_s7, %s437_s7 }
  0x2d   :  { %p444_p5 = por %p443_p4, %p442_p3 }
  0x2e   :  { %v56_v10 = vld [vmem:[#allocation2] sm:$0xff]  ;;  %v57_v13 = vld [vmem:[#allocation2 + $0x8] sm:$0xff] }
  0x2f   :  { %v58_v26 = vld [vmem:[#allocation2 + $0x10] sm:$0xff]  ;;  %v59_v29 = vld [vmem:[#allocation2 + $0x18] sm:$0xff]  ;;  %p445_p6 = pnand %p444_p5, %p438_p2 }
  0x30   :  { %v60_v50 = vld [vmem:[#allocation2 + $0x20] sm:$0xff]  ;;  %v61_v52 = vld [vmem:[#allocation2 + $0x28] sm:$0xff] }
  0x31   :  { %354 = vmatpush3.bf16.xpose.msra.mxu0 %v135_v4  ;;  %378 = vmatpush3.bf16.xpose.msra.mxu1 %v135_v4  ;;  %v62_v11 = vld [vmem:[#allocation2 + $0x30] sm:$0xff]  ;;  %v63_v15 = vld [vmem:[#allocation2 + $0x38] sm:$0xff] }
  0x32   :  { %v64_v27 = vld [vmem:[#allocation2 + $0x40] sm:$0xff]  ;;  %v65_v31 = vld [vmem:[#allocation2 + $0x48] sm:$0xff] }
  0x38   :  { %356 = vmatmul.mubr.msk.bf16.vlgmr.msra.gmra.mrb[0].mxu0 %vm45_vm0, %v388_v5  ;;  %368 = vmatmul.mubr.msk.bf16.vlgmr.msra.gmra.mrb[0].mxu1 %vm45_vm0, %v389_v6 }
  0x39   :  { %359 = vmatprep.mubr.msk.bf16.mxu0 %vm470_vm1, %v469_v0  ;;  %371 = vmatprep.mubr.msk.bf16.mxu1 %vm470_vm1, %v469_v0 }
  0x40   :  { %360 = vmatmul.mubr.msk.bf16.gmra.mrb[4].mxu0 %vm45_vm0, %v390_v7  ;;  %372 = vmatmul.mubr.msk.bf16.gmra.mrb[4].mxu1 %vm45_vm0, %v391_v8 }
  0x41   :  { %363 = vmatprep.mubr.msk.bf16.mxu0 %vm470_vm1, %v469_v0 }
  0x48   :  { %364 = vmatmul.mubr.msk.bf16.gmra.mrb[8].mxu0 %vm45_vm0, %v392_v9 }
 0x10b   :  { %v171_v12 = vpop.f32.mrb[0].mxu0  ;;  %v195_v14 = vpop.f32.mrb[0].mxu1 }
 0x10c   :  { %v210_v16 = vadd.f32 %v171_v12, %v56_v10  ;;  %v357_v17 = vpop.f32.mrb[1].mxu0  ;;  %v216_v18 = vadd.f32 %v195_v14, %v62_v11  ;;  %v369_v19 = vpop.f32.mrb[1].mxu1 }
 0x10d   :  { %v174_v20 = vpop.f32.mrb[2].mxu0  ;;  %v198_v21 = vpop.f32.mrb[2].mxu1 }
 0x10e   :  { %220 = vst.msk [vmem:[#allocation2] sm:$0xff] %vm45_vm0, %v210_v16  ;;  %v211_v22 = vadd.f32 %v174_v20, %v57_v13  ;;  %v358_v23 = vpop.f32.mrb[3].mxu0  ;;  %226 = vst.msk [vmem:[#allocation2 + $0x30] sm:$0xff] %vm45_vm0, %v216_v18  ;;  %v217_v24 = vadd.f32 %v198_v21, %v63_v15  ;;  %v370_v25 = vpop.f32.mrb[3].mxu1 }
 0x110   :  { %221 = vst.msk [vmem:[#allocation2 + $0x8] sm:$0xff] %vm45_vm0, %v211_v22  ;;  %227 = vst.msk [vmem:[#allocation2 + $0x38] sm:$0xff] %vm45_vm0, %v217_v24 }
 0x113   :  { %v179_v28 = vpop.f32.mrb[4].mxu0  ;;  %v203_v30 = vpop.f32.mrb[4].mxu1 }
 0x114   :  { %v212_v32 = vadd.f32 %v179_v28, %v58_v26  ;;  %v361_v33 = vpop.f32.mrb[5].mxu0  ;;  %v218_v34 = vadd.f32 %v203_v30, %v64_v27  ;;  %v373_v35 = vpop.f32.mrb[5].mxu1 }
 0x115   :  { %v233_v36 = vld [vmem:[#allocation2] sm:$0xff]  ;;  %v239_v37 = vld [vmem:[#allocation2 + $0x30] sm:$0xff]  ;;  %v182_v38 = vpop.f32.mrb[6].mxu0  ;;  %v206_v39 = vpop.f32.mrb[6].mxu1 }
 0x116   :  { %222 = vst.msk [vmem:[#allocation2 + $0x10] sm:$0xff] %vm45_vm0, %v212_v32  ;;  %v213_v40 = vadd.f32 %v182_v38, %v59_v29  ;;  %v362_v41 = vpop.f32.mrb[7].mxu0  ;;  %228 = vst.msk [vmem:[#allocation2 + $0x40] sm:$0xff] %vm45_vm0, %v218_v34  ;;  %v219_v42 = vadd.f32 %v206_v39, %v65_v31  ;;  %v374_v43 = vpop.f32.mrb[7].mxu1  ;;  %v334_v44 = vpack.c.bf16 %v233_v36, %v233_v36 }
 0x117   :  { %v340_v45 = vpack.c.bf16 %v239_v37, %v239_v37  ;;  %v234_v46 = vld [vmem:[#allocation2 + $0x8] sm:$0xff]  ;;  %v240_v47 = vld [vmem:[#allocation2 + $0x38] sm:$0xff] }
 0x118   :  { %223 = vst.msk [vmem:[#allocation2 + $0x18] sm:$0xff] %vm45_vm0, %v213_v40  ;;  %229 = vst.msk [vmem:[#allocation2 + $0x48] sm:$0xff] %vm45_vm0, %v219_v42  ;;  %v335_v48 = vpack.c.bf16 %v234_v46, %v234_v46  ;;  %v341_v49 = vpack.c.bf16 %v240_v47, %v240_v47 }
 0x119   :  { %284 = vst.msk [vmem:[#allocation8] sm:$0xf] %vm283_vm2, %v334_v44  ;;  %290 = vst.msk [vmem:[#allocation8 + $0x18] sm:$0xf] %vm283_vm2, %v340_v45 }
 0x11a   :  { %285 = vst.msk [vmem:[#allocation8 + $0x4] sm:$0xf] %vm283_vm2, %v335_v48  ;;  %291 = vst.msk [vmem:[#allocation8 + $0x1c] sm:$0xf] %vm283_vm2, %v341_v49 }
 0x11b   :  { %v187_v51 = vpop.f32.mrb[8].mxu0 }
 0x11c   :  { %v214_v53 = vadd.f32 %v187_v51, %v60_v50  ;;  %v365_v54 = vpop.f32.mrb[9].mxu0 }
 0x11d   :  { %v235_v55 = vld [vmem:[#allocation2 + $0x10] sm:$0xff]  ;;  %v241_v56 = vld [vmem:[#allocation2 + $0x40] sm:$0xff]  ;;  %v190_v57 = vpop.f32.mrb[10].mxu0 }
 0x11e   :  { %224 = vst.msk [vmem:[#allocation2 + $0x20] sm:$0xff] %vm45_vm0, %v214_v53  ;;  %v215_v58 = vadd.f32 %v190_v57, %v61_v52  ;;  %v366_v59 = vpop.f32.mrb[11].mxu0  ;;  %v336_v60 = vpack.c.bf16 %v235_v55, %v235_v55  ;;  %v342_v61 = vpack.c.bf16 %v241_v56, %v241_v56 }
 0x11f   :  { %v236_v62 = vld [vmem:[#allocation2 + $0x18] sm:$0xff]  ;;  %v242_v63 = vld [vmem:[#allocation2 + $0x48] sm:$0xff] }
 0x120   :  { %225 = vst.msk [vmem:[#allocation2 + $0x28] sm:$0xff] %vm45_vm0, %v215_v58  ;;  %v337_v0 = vpack.c.bf16 %v236_v62, %v236_v62  ;;  %v343_v1 = vpack.c.bf16 %v242_v63, %v242_v63 }
 0x121   :  { %286 = vst.msk [vmem:[#allocation8 + $0x8] sm:$0xf] %vm283_vm2, %v336_v60  ;;  %292 = vst.msk [vmem:[#allocation8 + $0x20] sm:$0xf] %vm283_vm2, %v342_v61 }
 0x122   :  { %287 = vst.msk [vmem:[#allocation8 + $0xc] sm:$0xf] %vm283_vm2, %v337_v0  ;;  %293 = vst.msk [vmem:[#allocation8 + $0x24] sm:$0xf] %vm283_vm2, %v343_v1 }
 0x125   :  { %v237_v2 = vld [vmem:[#allocation2 + $0x20] sm:$0xff] }
 0x126   :  { %v338_v3 = vpack.c.bf16 %v237_v2, %v237_v2 }
 0x127   :  { %v238_v4 = vld [vmem:[#allocation2 + $0x28] sm:$0xff] }
 0x128   :  { %v339_v5 = vpack.c.bf16 %v238_v4, %v238_v4  ;;  %288 = vst.msk [vmem:[#allocation8 + $0x10] sm:$0xf] %vm283_vm2, %v338_v3 }
 0x12a   :  { %289 = vst.msk [vmem:[#allocation8 + $0x14] sm:$0xf] %vm283_vm2, %v339_v5 }
 0x12b   :  { %448 = shalt.err (!%p445_p6)
}
 0x12c   :  { %s449_s10 = scalar_lea.hbm %s576_s2, 640 }
 0x12d   :  { %p450_p7 = scmp.ne.s32.totalorder %s576_s2, %s449_s10  ;;  %p453_p8 = scmp.lt.u32.totalorder %s449_s10, %s576_s2 }
 0x12f   :  { %p455_p9 = pnand %p453_p8, %p450_p7 }
 0x131   :  { %458 = shalt.err (!%p455_p9)
}
 0x132   :  { %305 = dma.vmem_to_hbm [thread:$0]  %s300_s6, 640, %s576_s2, [#allocation5], %s466_s19, %s466_s19, %s467_s20  }
 0x133   :  { %463 = dma.done.wait [#allocation5], 640  }
 0x134   :  { %464 = vsyncadd [#allocation5], 4294966656 }
 0x135   :  { %309 = vsyncpa [#allocation4], 1 }
 0x136   :  { %310 = vsyncpa [#allocation7], 1 }
 0x137   :  { %311 = vsyncpa [#allocation5], 1 }

</bundles_post_ra>
